<compile_context>
chip_gen: v7x
topology: tpu7x:2x2x1
jax: 0.10.0
libtpu: 0.0.40
codegen_flags: <defaults>
</compile_context>

<pallas_src>
import jax
import jax.numpy as jnp
from jax.experimental import pallas as pl
from jax.experimental.pallas import tpu as pltpu


# ----------------------------- helpers --------------------------------------

def _round_up(x, m):
    return ((x + m - 1) // m) * m


def _cdiv(a, b):
    return -(-a // b)


def _sublane(itemsize):
    # sublane packing: 8 rows for 32-bit, 16 for 16-bit, 32 for 8-bit dtypes
    return 8 * max(1, 4 // max(1, itemsize))


def _target_block_bytes():
    # ~4 MiB on v6e/v7x (fast HBM -> amortize 0.35us/step), ~2 MiB on v5e
    # (16 MiB default scoped VMEM; 2 MiB already ~90% of its roofline).
    try:
        kind = jax.devices()[0].device_kind.lower()
    except Exception:
        kind = ""
    if "v5 lite" in kind or "v5e" in kind or "v5lite" in kind:
        return 2 << 20
    return 4 << 20


def _choose_tiles(b, c, hw, itemsize, target_bytes, min_steps=8):
    """Pick (c_tile, hw_tile) for the (B, C, HW) layout."""
    sub = _sublane(itemsize)
    # Channel tile: only tile C when even a 128-lane full-C block overshoots
    # the target (huge feature maps).  Tiled c_tile is a multiple of the
    # sublane packing so sublanes stay full.
    if _round_up(c, sub) * 128 * itemsize > target_bytes:
        c_tile = max(sub, ((target_bytes // (128 * itemsize)) // sub) * sub)
        c_tile = min(c_tile, _round_up(c, sub))
    else:
        c_tile = c
    c_pad = _round_up(c_tile, sub)
    # Spatial tile: largest multiple of 128 keeping the (padded) block <= target.
    max_lanes = max(128, ((target_bytes // (c_pad * itemsize)) // 128) * 128)
    hw_tile = min(_round_up(hw, 128), max_lanes)

    # Keep enough grid steps that both v7x TensorCores get parallel work.
    def steps(ht):
        return b * _cdiv(hw, ht) * _cdiv(c, c_tile)

    while hw_tile > 128 and steps(hw_tile) < min_steps:
        hw_tile -= 128
    return c_tile, hw_tile


def _choose_flat_tile(b, n_lanes, itemsize, target_bytes, min_steps=8):
    """Lane tile for the flattened (B, 1, C*HW) small-spatial path."""
    sub = _sublane(itemsize)
    max_lanes = max(128, ((target_bytes // (sub * itemsize)) // 128) * 128)
    t = min(_round_up(n_lanes, 128), max_lanes)

    def steps(tt):
        return b * _cdiv(n_lanes, tt)

    while t > 128 and steps(t) < min_steps:
        t -= 128
    return t


def _vmem_limit(block_bytes):
    # double-buffered blocks + margin, clamped to safe bounds across gens
    return int(min(max(2 * block_bytes + (2 << 20), 16 << 20), 48 << 20))


# ----------------------------- kernels --------------------------------------

def _nchw_kernel(x_ref, n_ref, w_ref, o_ref):
    # x_ref/o_ref: (1, Ct, T); n_ref: (1, 1, T); w_ref: (Ct, 1) (= w*std)
    o_ref[...] = x_ref[...] + w_ref[...][None, :, :] * n_ref[...]


def _flat_kernel(x_ref, n_ref, w_ref, o_ref):
    # x_ref/n_ref/o_ref: (1, 1, T); w_ref: (1, 1, T) per-lane channel pattern
    o_ref[...] = x_ref[...] + w_ref[...] * n_ref[...]


# ----------------------------- wrapper --------------------------------------

def noise_injection(image, w, std, key, *, donate_image=False):
    """image: (B, C, H, W); w: (1, C, 1, 1); fresh N(0,1) noise per call."""
    b, c, h, wd = image.shape
    assert w.shape == (1, c, 1, 1)
    hw = h * wd
    dtype = image.dtype
    itemsize = dtype.itemsize
    target = _target_block_bytes()
    sub = _sublane(itemsize)

    # Fold std into w:  out = x + (w*std) * N(0,1)
    w_scaled = (w.reshape(c).astype(jnp.float32) * jnp.float32(std)).astype(dtype)
    io_alias = {0: 0} if donate_image else {}

    if hw < 128:
        # ---- small-spatial path: flatten so the output stays lane-dense ----
        n_lanes = c * hw
        x3 = image.reshape(b, 1, n_lanes)
        noise = jax.random.normal(key, (b, hw), dtype)            # native dtype
        n3 = jnp.tile(noise, (1, c)).reshape(b, 1, n_lanes)       # shared across C
        w_pat = jnp.repeat(w_scaled, hw).reshape(1, 1, n_lanes)   # per-lane scale

        t = _choose_flat_tile(b, n_lanes, itemsize, target)
        grid = (b, _cdiv(n_lanes, t))
        blk = sub * t * itemsize
        vmem = _vmem_limit(3 * blk)

        out = pl.pallas_call(
            _flat_kernel,
            out_shape=jax.ShapeDtypeStruct((b, 1, n_lanes), dtype),
            grid_spec=pltpu.PrefetchScalarGridSpec(
                num_scalar_prefetch=0,
                grid=grid,
                in_specs=[
                    pl.BlockSpec((1, 1, t), lambda i, j: (i, 0, j)),
                    pl.BlockSpec((1, 1, t), lambda i, j: (i, 0, j)),
                    pl.BlockSpec((1, 1, t), lambda i, j: (0, 0, j)),
                ],
                out_specs=pl.BlockSpec((1, 1, t), lambda i, j: (i, 0, j)),
            ),
            compiler_params=pltpu.CompilerParams(
                dimension_semantics=("parallel", "parallel"),
                vmem_limit_bytes=vmem,
            ),
            input_output_aliases=io_alias,
        )(x3, n3, w_pat)
        return out.reshape(b, c, h, wd)

    # ---- main path: (B, C, HW), noise shared across channels in-register ----
    x = image.reshape(b, c, hw)                                    # free reshape
    noise = jax.random.normal(key, (b, 1, hw), dtype)              # native dtype
    w_col = w_scaled.reshape(c, 1)

    c_tile, hw_tile = _choose_tiles(b, c, hw, itemsize, target)
    # C axis innermost so the noise block index is unchanged across it.
    grid = (b, _cdiv(hw, hw_tile), _cdiv(c, c_tile))

    c_pad = _round_up(c_tile, sub)
    x_blk = c_pad * hw_tile * itemsize
    n_blk = sub * hw_tile * itemsize
    vmem = _vmem_limit(2 * x_blk + n_blk)

    out = pl.pallas_call(
        _nchw_kernel,
        out_shape=jax.ShapeDtypeStruct((b, c, hw), dtype),
        grid_spec=pltpu.PrefetchScalarGridSpec(
            num_scalar_prefetch=0,
            grid=grid,
            in_specs=[
                pl.BlockSpec((1, c_tile, hw_tile), lambda bi, ji, ci: (bi, ci, ji)),
                pl.BlockSpec((1, 1, hw_tile), lambda bi, ji, ci: (bi, 0, ji)),
                pl.BlockSpec((c_tile, 1), lambda bi, ji, ci: (ci, 0)),
            ],
            out_specs=pl.BlockSpec((1, c_tile, hw_tile), lambda bi, ji, ci: (bi, ci, ji)),
        ),
        compiler_params=pltpu.CompilerParams(
            dimension_semantics=("parallel", "parallel", "parallel"),
            vmem_limit_bytes=vmem,
        ),
        input_output_aliases=io_alias,
    )(x, noise, w_col)
    return out.reshape(b, c, h, wd)


# ----------------------------- reference / test ------------------------------

def _reference(image, w, std, noise_bhw):
    b, c, h, wd = image.shape
    w_scaled = (w.reshape(1, c, 1, 1).astype(jnp.float32)
                * jnp.float32(std)).astype(image.dtype)
    return image + w_scaled * noise_bhw


if __name__ == "__main__":
    key = jax.random.PRNGKey(0)
    k_img, k_noise, k_img2, k_img3 = jax.random.split(key, 4)
    STD = 0.5

    # --- Case 1: main path (HW = 256, lane-dense tiles) ---
    B, C, H, W = 2, 4, 16, 16
    image = jax.random.normal(k_img, (B, C, H, W), dtype=jnp.float32)
    w_nz = jnp.linspace(0.5, 2.0, C, dtype=jnp.float32).reshape(1, C, 1, 1)

    out = jax.block_until_ready(noise_injection(image, w_nz, STD, k_noise))
    noise1 = jax.random.normal(k_noise, (B, 1, H * W), jnp.float32).reshape(B, 1, H, W)
    expected = _reference(image, w_nz, STD, noise1)
    assert out.shape == image.shape and out.dtype == image.dtype
    assert jnp.allclose(out, expected, atol=1e-5, rtol=1e-5), "main path mismatch"

    # w = 0 (module init) -> output == input
    w0 = jnp.zeros((1, C, 1, 1), jnp.float32)
    out0 = jax.block_until_ready(noise_injection(image, w0, STD, k_noise))
    assert jnp.allclose(out0, image), "w=0 must return the input unchanged"

    # --- Case 2: small-spatial path (HW = 64 < 128 lanes, flattened layout) ---
    B2, C2, H2, W2 = 2, 4, 8, 8
    image2 = jax.random.normal(k_img2, (B2, C2, H2, W2), dtype=jnp.float32)
    out2 = jax.block_until_ready(noise_injection(image2, w_nz, STD, k_noise))
    noise2 = jax.random.normal(k_noise, (B2, H2 * W2), jnp.float32).reshape(B2, 1, H2, W2)
    expected2 = _reference(image2, w_nz, STD, noise2)
    assert jnp.allclose(out2, expected2, atol=1e-5, rtol=1e-5), "small-HW path mismatch"

    # --- Case 3: ragged spatial extent (30x30 = 900, not a multiple of 128) ---
    B3, C3, H3, W3 = 1, 4, 30, 30
    image3 = jax.random.normal(k_img3, (B3, C3, H3, W3), dtype=jnp.float32)
    w3 = jnp.linspace(-1.0, 1.0, C3, dtype=jnp.float32).reshape(1, C3, 1, 1)
    out3 = jax.block_until_ready(noise_injection(image3, w3, STD, k_noise))
    noise3 = jax.random.normal(k_noise, (B3, 1, H3 * W3), jnp.float32).reshape(B3, 1, H3, W3)
    expected3 = _reference(image3, w3, STD, noise3)
    assert jnp.allclose(out3, expected3, atol=1e-5, rtol=1e-5), "ragged-HW path mismatch"

    print("KERNEL_OK")
</pallas_src>

<mosaic_0001>
module attributes {stable_mosaic.version = 11 : i64} {
  func.func @_nchw_kernel(%arg0: i32, %arg1: i32, %arg2: i32, %arg3: memref<1x4x128xf32, #tpu.memory_space<vmem>>, %arg4: memref<1x1x128xf32, #tpu.memory_space<vmem>>, %arg5: memref<4x1xf32, #tpu.memory_space<vmem>>, %arg6: memref<1x4x128xf32, #tpu.memory_space<vmem>>) attributes {dimension_semantics = [#tpu.dimension_semantics<parallel>, #tpu.dimension_semantics<parallel>, #tpu.dimension_semantics<parallel>], iteration_bounds = array<i64: 2, 2, 1>, scalar_prefetch = 0 : i64, scratch_operands = 0 : i64, tpu.core_type = #tpu.core_type<tc>, window_params = [{transform_indices = @transform_0, window_bounds = array<i64: 1, 4, 128>}, {transform_indices = @transform_1, window_bounds = array<i64: 1, 1, 128>}, {transform_indices = @transform_2, window_bounds = array<i64: 4, 1>}, {transform_indices = @transform_3, window_bounds = array<i64: 1, 4, 128>}]} {
    %c0 = arith.constant 0 : index
    %c0_0 = arith.constant 0 : index
    %c0_1 = arith.constant 0 : index
    %0 = vector.load %arg3[%c0, %c0_0, %c0_1] : memref<1x4x128xf32, #tpu.memory_space<vmem>>, vector<1x4x128xf32>
    %c0_2 = arith.constant 0 : index
    %c0_3 = arith.constant 0 : index
    %1 = vector.load %arg5[%c0_2, %c0_3] : memref<4x1xf32, #tpu.memory_space<vmem>>, vector<4x1xf32>
    %2 = vector.shape_cast %1 : vector<4x1xf32> to vector<1x4x1xf32>
    %c0_4 = arith.constant 0 : index
    %c0_5 = arith.constant 0 : index
    %c0_6 = arith.constant 0 : index
    %3 = vector.load %arg4[%c0_4, %c0_5, %c0_6] : memref<1x1x128xf32, #tpu.memory_space<vmem>>, vector<1x1x128xf32>
    %4 = vector.broadcast %2 : vector<1x4x1xf32> to vector<1x4x128xf32>
    %5 = vector.broadcast %3 : vector<1x1x128xf32> to vector<1x4x128xf32>
    %6 = arith.mulf %4, %5 : vector<1x4x128xf32>
    %7 = arith.addf %0, %6 : vector<1x4x128xf32>
    %c0_7 = arith.constant 0 : index
    %c0_8 = arith.constant 0 : index
    %c0_9 = arith.constant 0 : index
    %8 = vector.load %arg6[%c0_7, %c0_8, %c0_9] : memref<1x4x128xf32, #tpu.memory_space<vmem>>, vector<1x4x128xf32>
    tpu.vector_store %arg6[%c0_7, %c0_8, %c0_9], %7 {strides = array<i32>} : memref<1x4x128xf32, #tpu.memory_space<vmem>>, vector<1x4x128xf32>,
    return
  }
  func.func @transform_0(%arg0: i32, %arg1: i32, %arg2: i32) -> (i32, i32, i32) {
    %c0_i32 = arith.constant 0 : i32
    return %arg0, %arg2, %arg1 : i32, i32, i32
  }
  func.func @transform_1(%arg0: i32, %arg1: i32, %arg2: i32) -> (i32, i32, i32) {
    %c0_i32 = arith.constant 0 : i32
    %c0_i32_0 = arith.constant 0 : i32
    return %arg0, %c0_i32, %arg1 : i32, i32, i32
  }
  func.func @transform_2(%arg0: i32, %arg1: i32, %arg2: i32) -> (i32, i32) {
    %c0_i32 = arith.constant 0 : i32
    %c0_i32_0 = arith.constant 0 : i32
    return %arg2, %c0_i32 : i32, i32
  }
  func.func @transform_3(%arg0: i32, %arg1: i32, %arg2: i32) -> (i32, i32, i32) {
    %c0_i32 = arith.constant 0 : i32
    return %arg0, %arg2, %arg1 : i32, i32, i32
  }
}

</mosaic_0001>

<bundles_post_ra>
// kernel: tpu_custom_call.1
= control target key start
LH: loop header
LB: loop body
LE: loop exit
PB: predicated region body
PF: predicated region fallthrough
CT: control target
= control target key end

     0   :  { %s874_s0 = inlined_call_operand.hbm [shape: f32[2,4,256], index: 0, kind: input, shape index: {}]   ;;  %s875_s1 = inlined_call_operand.vmem [shape: f32[2,1,256], index: 1, kind: input, shape index: {}]   ;;  %s876_s2 = inlined_call_operand.vmem [shape: f32[4,1], index: 2, kind: input, shape index: {}]   ;;  %s877_s3 = inlined_call_operand.hbm [shape: f32[2,4,256], index: 3, kind: output, shape index: {}]  }
   0x1   :  { %880 = sst [smem:[#allocation9_spill]] %s874_s0 }
   0x2   :  { %881 = sst [smem:[#allocation10_spill]] %s876_s2 }
   0x3   :  { %8 = vsyncpa [#allocation3], 0 }
   0x4   :  { %10 = vsyncpa [#allocation3 + $0x1], 0 }
   0x5   :  { %11 = vsyncpa [#allocation4], 0 }
   0x6   :  { %13 = vsyncpa [#allocation4 + $0x1], 0  ;;  %s670_s12 = smov 0   ;;  %s672_s13 = smov 0  }
   0x7   :  { %s674_s14 = smov 0   ;;  %s676_s15 = smov 0  }
   0x8   :  { %s678_s16 = smov 0   ;;  %s680_s17 = smov 0  }
   0x9   :  { %s682_s18 = smov 0   ;;  %s684_s19 = smov 0  }
   0xa LB: > { %s419_s20 = sadd.s32 4294967295, %s645_s19   ;;  %s420_s21 = sadd.s32 4294967294, %s645_s19   ;;  %s645_s19 = sphi %s684_s19, %s19_s19   ;;  %s641_s18 = sphi %s682_s18, %s901_s18   ;;  %s637_s17 = sphi %s680_s17, %s900_s17   ;;  %s633_s16 = sphi %s678_s16, %s899_s16   ;;  %s629_s15 = sphi %s676_s15, %s898_s15   ;;  %s625_s14 = sphi %s674_s14, %s897_s14   ;;  %s621_s13 = sphi %s672_s13, %s896_s13   ;;  %s617_s12 = sphi %s670_s12, %s895_s12  }
   0xb   : > { %s34_s22 = sadd.s32 1, %s637_s17  ;;  %s38_s23 = sadd.s32 1, %s641_s18 }
   0xc   : > { %p36_p0 = scmp.ge.s32.totalorder %s34_s22, 2  ;;  %s49_s24 = sadd.s32 1, %s625_s14 }
   0xd   : > { %p56_p1 = scmp.ne.s32.totalorder %s625_s14, %s621_s13  ;;  %p57_p2 = scmp.eq.s32.totalorder %s645_s19, 0 }
   0xe   : > { %s903_s22 = smov (%p36_p0, %s34_s22), 0  ;;  %s905_s23 = smov (!%p36_p0, %s38_s23), %s641_s18 }
   0xf   : > { %s45_s25 = ssub.s32 %s637_s17, %s903_s22  ;;  %p723_p3 = por %p57_p2, %p56_p1 }
  0x10   : > { %p40_p4 = scmp.ge.s32.totalorder %s905_s23, 2  ;;  %p62_p5 = scmp.ne.s32.totalorder %s621_s13, %s617_s12 }
  0x11   : > { %p63_p6 = scmp.eq.s32.totalorder %s419_s20, 0  ;;  %p144_p7 = scmp.eq.s32.totalorder %s419_s20, 3 }
  0x12   : > { %s907_s23 = smov (%p40_p4, %s905_s23), 0  ;;  %p150_p10 = scmp.eq.s32.totalorder %s420_s21, 3 }
  0x13   : > { %883 = sst [smem:[#allocation8_spill]] %s907_s23  ;;  %p731_p8 = por %p63_p6, %p62_p5 }
  0x14   : > { %p735_p9 = por %p144_p7, %p56_p1  ;;  %s42_s29 = ssub.s32 %s641_s18, %s907_s23 }
  0x15   : > { %s46_s30 = sor.u32 %s45_s25, %s42_s29  ;;  %p741_p12 = por %p150_p10, %p62_p5 }
  0x16   : > { %s885_s28 = scalar_select %p735_p9, 1, 0 }
  0x17   : > { %p47_p11 = scmp.eq.s32.totalorder %s46_s30, 0  ;;  %p449_p13 = scmp.lt.s32.totalorder %s645_s19, 4 }
  0x18   : > { %s886_s4 = scalar_select %p741_p12, 1, 0 }
  0x19   : > { %s177_s5 = sand.u32 1, %s625_s14   ;;  %s425_s8 = sshll.u32 %s641_s18, 1 }
  0x1a   : > { %s748_s6 = scalar_select %p47_p11, %s625_s14, %s49_s24  }
  0x1b   : > { %s424_s7 = sshll.u32 %s177_s5, 2  ;;  %s188_s9 = sadd.s32 %s637_s17, %s425_s8 }
  0x1c   : > { %s181_s10 = scalar_lea.vmem [#allocation2], %s424_s7  ;;  %s426_s20 = sshll.u32 %s188_s9, 6 }
  0x1d   : > { %s192_s11 = sshll.u32 %s181_s10, 4  ;;  %s887_s0 = sld [smem:[#allocation9_spill]]  ;;  %s752_s11 = int_to_ptr.vmem [resolvable:$true] %s192_s11 }
  0x1e   : > { %p761_p0 = pnand %p449_p13, %p723_p3  ;;  %s178_s30 = scalar_lea.sflag [#allocation3], %s177_s5 }
  0x20   : > { %p519_p5 = pneg %p761_p0 }
  0x23   : > { %s757_s29 = scalar_lea.hbm %s887_s0, %s426_s20  ;;  %s522_s9 = scalar_lea.hbm %s887_s0, 256 }
  0x24   : > { %s517_s7 = scalar_lea.hbm %s757_s29, 64  ;;  %p523_p3 = scmp.lt.u32.totalorder %s757_s29, %s887_s0 }
  0x25   : > { %p518_p4 = scmp.ne.s32.totalorder %s757_s29, %s517_s7  ;;  %p524_p10 = scmp.lt.u32.totalorder %s522_s9, %s517_s7 }
  0x26   : > { %p526_p13 = scmp.lt.u32.totalorder %s517_s7, %s757_s29 }
  0x27   : > { %p520_p6 = pnand %p519_p5, %p518_p4  ;;  %p525_p11 = por %p524_p10, %p523_p3 }
  0x29   : > { %p521_p7 = pneg %p520_p6  ;;  %p527_p1 = por %p526_p13, %p525_p11 }
  0x2b   : > { %p528_p2 = pnand %p527_p1, %p521_p7 }
  0x2d   : > { %531 = shalt.err (!%p528_p2)
}
  0x2e   : > { %s532_s5 = scalar_lea.vmem %s752_s11, 64  ;;  %s647_s21 = smov [#allocation2]  }
  0x2f   : > { %p533_p4 = scmp.ne.s32.totalorder %s752_s11, %s532_s5  ;;  %s537_s25 = sshll.u32 %s647_s21, 4  ;;  %s538_s25 = int_to_ptr.vmem [resolvable:$false] %s537_s25 }
  0x30   : > { %s539_s26 = scalar_lea.vmem %s538_s25, 128  ;;  %p540_p9 = scmp.lt.s32.totalorder %s752_s11, %s538_s25 }
  0x31   : > { %p535_p6 = pnand %p533_p4, %p519_p5  ;;  %p541_p3 = scmp.lt.s32.totalorder %s539_s26, %s532_s5 }
  0x33   : > { %p536_p12 = pneg %p535_p6  ;;  %p542_p10 = por %p541_p3, %p540_p9 }
  0x35   : > { %p543_p11 = pnand %p542_p10, %p536_p12 }
  0x37   : > { %546 = shalt.err (!%p543_p11)
}
  0x38   : > { %444 = dma.hbm_to_vmem [thread:$0]  (!%p761_p0), %s757_s29, 64, %s752_s11, %s178_s30  }
  0x39   : > { %p889_p1 = scmp.lt.s32.totalorder %s645_s19, 5  ;;  %p890_p2 = scmp.ge.s32.totalorder %s645_s19, 1 }
  0x3b   : > { %p208_p5 = pnand %p890_p2, %p889_p1 }
  0x3c   : > { %s797_s7 = sand.u32 (!%p208_p5), 1, %s621_s13  }
  0x3d   : > { %211 = sbr.rel (%p208_p5) target bundleno = 222 (0xde), region = 32  ;;  %s428_s8 = sshll.u32 (!%p208_p5), %s797_s7, 2 }
  0x3e   : > { %s214_s9 = scalar_lea.sflag (!%p208_p5), [#allocation3], %s797_s7  ;;  %s217_s10 = scalar_lea.vmem (!%p208_p5), [#allocation2], %s428_s8 }
  0x44   : > { %608 = dma.done.wait (%p731_p8), %s214_s9, 64  }
  0x45   : > { %610 = vsyncadd (%p731_p8), %s214_s9, 4294967232  ;;  %v648_v0 = vmov 0   ;;  %s891_s2 = sld [smem:[#allocation10_spill]]  ;;  %p251_p9 = scmp.lt.s32.totalorder %s633_s16, 1  ;;  %v262_v4 = vld [vmem:[%s217_s10] sm:$0xf] }
  0x46   : > { %516 = vset.pattern.permute.xlu0 %v648_v0  ;;  %p253_p12 = scmp.lt.s32.totalorder %s629_s15, 1  ;;  %s433_s5 = sshll.u32 %s633_s16, 1 }
  0x47   : > { %s252_s24 = scalar_select %p251_p9, %s633_s16, 1 }
  0x48   : > { %s254_s30 = scalar_select %p253_p12, %s629_s15, 1 }
  0x49   : > { %s430_s20 = sshll.u32 %s252_s24, 1  ;;  %s293_s9 = sadd.s32 %s629_s15, %s433_s5 }
  0x4a   : > { %s256_s27 = sadd.s32 %s430_s20, %s254_s30  ;;  %s434_s11 = sshll.u32 %s293_s9, 6 }
  0x4b   : > { %v263_v1 = vld [vmem:[%s891_s2] sm:$0xf]  ;;  %s257_s26 = scalar_lea.vmem %s875_s1, %s256_s27  ;;  %s250_s29 = scalar_lea.vmem [#allocation5], %s428_s8 }
  0x4c   : > { %267 = vperm.xlu0 %516, %v263_v1   ;;  %v431_v2 = vld [vmem:[%s257_s26] ss:$0 sm:$0xff]  ;;  %s297_s0 = sshll.u32 %s250_s29, 4  ;;  %s820_s24 = scalar_lea.hbm %s877_s3, %s434_s11  ;;  %s822_s0 = int_to_ptr.vmem [resolvable:$true] %s297_s0 }
  0x4d   : > { %s280_s15 = scalar_lea.sflag [#allocation4], %s797_s7  ;;  %s547_s16 = scalar_lea.vmem %s822_s0, 64 }
  0x4e   : > { %p548_p8 = scmp.ne.s32.totalorder %s822_s0, %s547_s16  ;;  %p892_p0 = scmp.ne.s32.totalorder %s885_s28, 0 }
  0x4f   : > { %s649_s8 = smov [#allocation5]  }
  0x50   : > { %p549_p7 = pnand %p548_p8, %p892_p0  ;;  %s551_s10 = sshll.u32 %s649_s8, 4  ;;  %s552_s10 = int_to_ptr.vmem [resolvable:$false] %s551_s10 }
  0x51   : > { %s553_s30 = scalar_lea.vmem %s552_s10, 128  ;;  %p554_p4 = scmp.lt.s32.totalorder %s822_s0, %s552_s10 }
  0x52   : > { %p550_p13 = pneg %p549_p7  ;;  %p555_p6 = scmp.lt.s32.totalorder %s553_s30, %s547_s16 }
  0x54   : > { %p556_p3 = por %p555_p6, %p554_p4 }
  0x56   : > { %p557_p10 = pnand %p556_p3, %p550_p13 }
  0xcb   : > { %v268_v3 = vpop.permute.xlu0 %267 }
  0xcc   : > { %v276_v5 = vmul.f32 %v431_v2, %v268_v3 }
  0xce   : > { %v277_v6 = vadd.f32 %v276_v5, %v262_v4 }
  0xd0   : > { %278 = vst [vmem:[%s250_s29] sm:$0xf] %v277_v6 }
  0xd1   : > { %560 = shalt.err (!%p557_p10)
}
  0xd2   : > { %s561_s2 = scalar_lea.hbm %s820_s24, 64  ;;  %s565_s20 = scalar_lea.hbm %s877_s3, 256 }
  0xd3   : > { %p562_p11 = scmp.ne.s32.totalorder %s820_s24, %s561_s2  ;;  %p566_p5 = scmp.lt.u32.totalorder %s820_s24, %s877_s3 }
  0xd4   : > { %p567_p9 = scmp.lt.u32.totalorder %s565_s20, %s561_s2  ;;  %p569_p8 = scmp.lt.u32.totalorder %s561_s2, %s820_s24 }
  0xd5   : > { %p563_p1 = pnand %p562_p11, %p892_p0 }
  0xd6   : > { %p568_p12 = por %p567_p9, %p566_p5 }
  0xd7   : > { %p564_p2 = pneg %p563_p1 }
  0xd8   : > { %p570_p7 = por %p569_p8, %p568_p12 }
  0xda   : > { %p571_p13 = pnand %p570_p7, %p564_p2 }
  0xdc   : > { %574 = shalt.err (!%p571_p13)
}
  0xdd   : > { %439 = dma.vmem_to_hbm [thread:$0]  (%p892_p0), %s822_s0, 64, %s820_s24, %s280_s15  }
  0xde PF: > { %p450_p4 = scmp.ge.s32.totalorder %s645_s19, 2  ;;  %s309_s21 = sand.u32 1, %s617_s12  }
  0xdf   : > { %p893_p6 = scmp.ne.s32.totalorder %s886_s4, 0  ;;  %s310_s25 = scalar_lea.sflag [#allocation4], %s309_s21 }
  0xe1   : > { %p446_p3 = pnand %p450_p4, %p893_p6 }
  0xe3   : > { %612 = dma.done.wait (!%p446_p3), %s310_s25, 64  }
  0xe4   : > { %614 = vsyncadd (!%p446_p3), %s310_s25, 4294967232  ;;  %s19_s19 = sadd.s32 1, %s645_s19   ;;  %s894_s0 = sld [smem:[#allocation8_spill]] }
  0xe5   : > { %p16_p10 = scmp.ge.s32.totalorder %s19_s19, 6   ;;  %s895_s12 = smov %s621_s13 }
  0xe6   : > { %s896_s13 = smov %s625_s14  ;;  %s897_s14 = smov %s748_s6 }
  0xe7   : > { %s898_s15 = smov %s637_s17  ;;  %s899_s16 = smov %s641_s18 }
  0xe8   : > { %s900_s17 = smov %s903_s22  ;;  %18 = sbr.rel (!%p16_p10) target bundleno = 10 (0xa), region = 83 }
  0xea   : > { %s901_s18 = smov %s894_s0 }
  0xef   :  { %315 = vsyncpa [#allocation3], 1 }
  0xf0   :  { %317 = vsyncpa [#allocation3 + $0x1], 1 }
  0xf1   :  { %318 = vsyncpa [#allocation4], 1 }
  0xf2   :  { %320 = vsyncpa [#allocation4 + $0x1], 1 }

</bundles_post_ra>
